<compile_context>
chip_gen: v7x
topology: tpu7x:2x2x1
jax: 0.10.0
libtpu: 0.0.40
codegen_flags: <defaults>
</compile_context>

<pallas_src>
import functools

import numpy as np
import jax
import jax.numpy as jnp
from jax import lax
from jax.experimental import pallas as pl
from jax.experimental.pallas import tpu as pltpu


def _round_up(x, m):
    return ((x + m - 1) // m) * m


# ---------------------------------------------------------------------------
# Pallas kernel
# ---------------------------------------------------------------------------
def sharpnet_kernel(lens_ref, sig_ref,
                    w1m_ref, w1c_ref, w1p_ref, t1_ref,
                    w2m_ref, w2c_ref, w2p_ref, t2_ref,
                    w3m_ref, w3c_ref, w3p_ref, t3_ref,
                    fw1_ref, fb1_ref, fw2_ref, fb2_ref,
                    out_ref, *, tb, length, lpad):
    f32 = jnp.float32
    base = pl.program_id(0) * tb

    # ---- hoisted per-step constants (iota masks; computed once, closed over) ----
    lane = lax.broadcasted_iota(jnp.int32, (1, lpad), 1)
    pad_keep = lane < length                       # lanes belonging to the real sequence
    need_edge_mask = (lpad == length)              # no spare zero pad lane to wrap through
    first_col = lane == 0
    last_col = lane == (length - 1)

    inv_n = 1.0 / float(length)                    # pool denominators use ORIGINAL length
    inv_nm1 = 1.0 / float(max(length - 1, 1))

    # (C,1)/(C,Cin) weights and shifts used directly -- no materialized broadcast_to.
    w1m = w1m_ref[...]; w1c = w1c_ref[...]; w1p = w1p_ref[...]; t1 = t1_ref[...]
    w2m = w2m_ref[...]; w2c = w2c_ref[...]; w2p = w2p_ref[...]; t2 = t2_ref[...]
    w3m = w3m_ref[...]; w3c = w3c_ref[...]; w3p = w3p_ref[...]; t3 = t3_ref[...]
    fw1 = fw1_ref[...]; fb1 = fb1_ref[...]; fw2 = fw2_ref[...]; fb2 = fb2_ref[...]

    def shifted(x):
        """x[:, l-1] and x[:, l+1] with conv zero padding at the sequence edges."""
        xm = pltpu.roll(x, 1, 1)                   # x[l-1]
        xp = pltpu.roll(x, lpad - 1, 1)            # x[l+1]
        if need_edge_mask:                         # only when L == Lp (no zero pad lane)
            xm = jnp.where(first_col, 0.0, xm)
            xp = jnp.where(last_col, 0.0, xp)
        return xm, xp

    def body(b, carry):
        x0 = sig_ref[pl.ds(b, 1), :]               # (1, Lp); pad lanes are zero

        # layer 1 (Cin=1): VPU broadcast multiply-adds (no MXU)
        xm, xp = shifted(x0)
        y = w1m * xm + w1c * x0 + w1p * xp + t1    # (8, Lp)
        y = jnp.where(pad_keep, jnp.maximum(y, 0.0), 0.0)

        # layer 2: three accumulating (16,8)@(8,Lp) dots -- no stacked concat
        xm, xp = shifted(y)
        y = (jnp.dot(w2m, xm, preferred_element_type=f32)
             + jnp.dot(w2c, y, preferred_element_type=f32)
             + jnp.dot(w2p, xp, preferred_element_type=f32) + t2)
        y = jnp.where(pad_keep, jnp.maximum(y, 0.0), 0.0)            # (16, Lp)

        # layer 3: three (32,16)@(16,Lp) dots; sequence-length mask fused into ReLU
        xm, xp = shifted(y)
        y = (jnp.dot(w3m, xm, preferred_element_type=f32)
             + jnp.dot(w3c, y, preferred_element_type=f32)
             + jnp.dot(w3p, xp, preferred_element_type=f32) + t3)
        keep = lane < lens_ref[base + b]
        y = jnp.where(keep, jnp.maximum(y, 0.0), 0.0)                # (32, Lp)

        # pooling: one pass (sum / sum-of-squares); mean/std over the ORIGINAL length
        s1 = jnp.sum(y, axis=1, keepdims=True)                       # (32, 1)
        s2 = jnp.sum(y * y, axis=1, keepdims=True)                   # (32, 1)
        mean = s1 * inv_n
        std = jnp.sqrt(jnp.maximum(s2 - mean * s1, 0.0) * inv_nm1)
        pool = jnp.concatenate([mean, std], axis=0)                  # (64, 1)

        # per-sample classifier (Dropout(0.3) is eval-mode identity); avoids any
        # dynamic-lane pool scatter -- classifier cost is ~1% of the conv stack.
        h = jnp.maximum(jnp.dot(fw1, pool, preferred_element_type=f32) + fb1, 0.0)
        o = jnp.dot(fw2, h, preferred_element_type=f32) + fb2        # (1, 1)
        out_ref[pl.ds(b, 1), :] = o                                  # dynamic-sublane store
        return carry

    lax.fori_loop(0, tb, body, 0)


def sharpnet_forward(signal, lens, kparams, *, batch_block=128,
                     vmem_limit_bytes=48 * 1024 * 1024):
    B, L = signal.shape
    l_pad = _round_up(L, 128)                      # lane-dense sequence length

    # Batch tile: large (target >=128) to amortize per-grid-step overhead, multiple
    # of 8 (sublane rule), not bigger than the (8-rounded) real batch, split in two
    # when possible so v7x's two TensorCores both get a "parallel" step, and capped
    # so the double-buffered (tb, l_pad) signal block stays well inside scoped VMEM.
    tb = min(_round_up(batch_block, 8), _round_up(B, 8))
    if _round_up(B, 8) >= 16 and _round_up(B, 8) // tb < 2:
        tb = _round_up((B + 1) // 2, 8)
    max_tb = max(8, (vmem_limit_bytes // (3 * 4 * l_pad)) // 8 * 8)
    tb = max(8, min(tb, max_tb))
    b_pad = _round_up(B, tb)
    n_blocks = b_pad // tb

    sig = jnp.zeros((b_pad, l_pad), jnp.float32).at[:B, :L].set(signal.astype(jnp.float32))
    lens_p = jnp.full((b_pad,), L, jnp.int32).at[:B].set(lens.astype(jnp.int32))

    kernel = functools.partial(sharpnet_kernel, tb=tb, length=L, lpad=l_pad)

    grid_spec = pltpu.PrefetchScalarGridSpec(
        num_scalar_prefetch=1,                     # lens -> SMEM
        grid=(n_blocks,),
        in_specs=[pl.BlockSpec((tb, l_pad), lambda i, lens_ref: (i, 0))]
                 + [pl.BlockSpec(p.shape, lambda i, lens_ref: (0, 0)) for p in kparams],
        out_specs=pl.BlockSpec((tb, 1), lambda i, lens_ref: (i, 0)),
    )
    out = pl.pallas_call(
        kernel,
        out_shape=jax.ShapeDtypeStruct((b_pad, 1), jnp.float32),
        grid_spec=grid_spec,
        compiler_params=pltpu.CompilerParams(
            dimension_semantics=("parallel",),     # megacore sharding on v7x
            vmem_limit_bytes=vmem_limit_bytes),
    )(lens_p, sig, *kparams)
    return out[:B]                                 # (B, 1)


# ---------------------------------------------------------------------------
# Deterministic parameter construction (synthetic; matches nn.Module shapes)
# ---------------------------------------------------------------------------
def init_params(key):
    ks = list(jax.random.split(key, 4))
    convs = []
    cins, couts = [1, 8, 16], [8, 16, 32]
    for i, (cin, cout) in enumerate(zip(cins, couts)):
        k = jax.random.split(ks[i], 6)
        w = jax.random.normal(k[0], (cout, cin, 3), jnp.float32) / np.sqrt(3.0 * cin)
        b = 0.1 * jax.random.normal(k[1], (cout,), jnp.float32)
        gamma = 1.0 + 0.1 * jax.random.normal(k[2], (cout,), jnp.float32)
        beta = 0.1 * jax.random.normal(k[3], (cout,), jnp.float32)
        rmean = 0.1 * jax.random.normal(k[4], (cout,), jnp.float32)
        rvar = 1.0 + 0.5 * jax.random.uniform(k[5], (cout,), jnp.float32)
        convs.append((w, b, gamma, beta, rmean, rvar))
    kf = jax.random.split(ks[3], 4)
    fw1 = jax.random.normal(kf[0], (32, 64), jnp.float32) / 8.0
    fb1 = 0.1 * jax.random.normal(kf[1], (32,), jnp.float32)
    fw2 = jax.random.normal(kf[2], (1, 32), jnp.float32) / np.sqrt(32.0)
    fb2 = 0.1 * jax.random.normal(kf[3], (1,), jnp.float32)
    return {"convs": convs, "fc": (fw1, fb1, fw2, fb2)}


def fold_params(raw, eps=1e-5):
    """Fold conv bias + inference BatchNorm into per-tap conv weights / per-channel shift."""
    kparams = []
    for (w, b, gamma, beta, rmean, rvar) in raw["convs"]:
        scale = gamma / jnp.sqrt(rvar + eps)                 # (Cout,)
        shift = (b - rmean) * scale + beta                   # (Cout,)
        wf = w * scale[:, None, None]                        # (Cout, Cin, 3)
        # taps kept separate: k=0 pairs with x[l-1], k=1 with x[l], k=2 with x[l+1]
        kparams += [wf[:, :, 0], wf[:, :, 1], wf[:, :, 2], shift[:, None]]
    fw1, fb1, fw2, fb2 = raw["fc"]
    kparams += [fw1, fb1[:, None], fw2, fb2[:, None]]
    return kparams


# ---------------------------------------------------------------------------
# Pure-JAX reference (mirrors the PyTorch forward, eval mode)
# ---------------------------------------------------------------------------
def reference_forward(signal, lens, raw, eps=1e-5):
    x = signal.astype(jnp.float32)[:, None, :]               # (B, 1, L)
    for (w, b, gamma, beta, rmean, rvar) in raw["convs"]:
        y = lax.conv_general_dilated(x, w, window_strides=(1,), padding=[(1, 1)],
                                     dimension_numbers=("NCH", "OIH", "NCH"))
        y = y + b[None, :, None]
        y = (y - rmean[None, :, None]) / jnp.sqrt(rvar[None, :, None] + eps)
        y = y * gamma[None, :, None] + beta[None, :, None]
        x = jnp.maximum(y, 0.0)
    L = signal.shape[1]
    mask = (jnp.arange(L)[None, :] < lens[:, None]).astype(jnp.float32)
    x = x * mask[:, None, :]
    pool = jnp.concatenate([x.mean(axis=2), x.std(axis=2, ddof=1)], axis=1)  # (B, 64)
    fw1, fb1, fw2, fb2 = raw["fc"]
    h = jnp.maximum(pool @ fw1.T + fb1, 0.0)
    return h @ fw2.T + fb2                                    # (B, 1)


if __name__ == "__main__":
    key = jax.random.PRNGKey(0)
    ksig, kpar = jax.random.split(key)
    B, L = 2, 16
    signal = jax.random.normal(ksig, (B, L), jnp.float32)
    lens = jnp.array([11, 16], dtype=jnp.int32)

    raw = init_params(kpar)
    kparams = fold_params(raw)

    out = sharpnet_forward(signal, lens, kparams)
    out = jax.block_until_ready(out)

    ref = reference_forward(signal, lens, raw)
    np.testing.assert_allclose(np.asarray(out), np.asarray(ref), rtol=2e-3, atol=2e-3)
    print("KERNEL_OK")
</pallas_src>

<mosaic_0001>
module attributes {stable_mosaic.version = 11 : i64} {
  func.func @sharpnet_kernel(%arg0: i32, %arg1: memref<8xi32, #tpu.memory_space<smem>>, %arg2: memref<8x128xf32, #tpu.memory_space<vmem>>, %arg3: memref<8x1xf32, #tpu.memory_space<vmem>>, %arg4: memref<8x1xf32, #tpu.memory_space<vmem>>, %arg5: memref<8x1xf32, #tpu.memory_space<vmem>>, %arg6: memref<8x1xf32, #tpu.memory_space<vmem>>, %arg7: memref<16x8xf32, #tpu.memory_space<vmem>>, %arg8: memref<16x8xf32, #tpu.memory_space<vmem>>, %arg9: memref<16x8xf32, #tpu.memory_space<vmem>>, %arg10: memref<16x1xf32, #tpu.memory_space<vmem>>, %arg11: memref<32x16xf32, #tpu.memory_space<vmem>>, %arg12: memref<32x16xf32, #tpu.memory_space<vmem>>, %arg13: memref<32x16xf32, #tpu.memory_space<vmem>>, %arg14: memref<32x1xf32, #tpu.memory_space<vmem>>, %arg15: memref<32x64xf32, #tpu.memory_space<vmem>>, %arg16: memref<32x1xf32, #tpu.memory_space<vmem>>, %arg17: memref<1x32xf32, #tpu.memory_space<vmem>>, %arg18: memref<1x1xf32, #tpu.memory_space<vmem>>, %arg19: memref<8x1xf32, #tpu.memory_space<vmem>>) attributes {dimension_semantics = [#tpu.dimension_semantics<parallel>], iteration_bounds = array<i64: 1>, scalar_prefetch = 1 : i64, scratch_operands = 0 : i64, tpu.core_type = #tpu.core_type<tc>, window_params = [{transform_indices = @transform_0, window_bounds = array<i64: 8, 128>}, {pipeline_mode = #tpu.pipeline_mode<synchronous>, transform_indices = @transform_1, window_bounds = array<i64: 8, 1>}, {pipeline_mode = #tpu.pipeline_mode<synchronous>, transform_indices = @transform_2, window_bounds = array<i64: 8, 1>}, {pipeline_mode = #tpu.pipeline_mode<synchronous>, transform_indices = @transform_3, window_bounds = array<i64: 8, 1>}, {pipeline_mode = #tpu.pipeline_mode<synchronous>, transform_indices = @transform_4, window_bounds = array<i64: 8, 1>}, {pipeline_mode = #tpu.pipeline_mode<synchronous>, transform_indices = @transform_5, window_bounds = array<i64: 16, 8>}, {pipeline_mode = #tpu.pipeline_mode<synchronous>, transform_indices = @transform_6, window_bounds = array<i64: 16, 8>}, {pipeline_mode = #tpu.pipeline_mode<synchronous>, transform_indices = @transform_7, window_bounds = array<i64: 16, 8>}, {pipeline_mode = #tpu.pipeline_mode<synchronous>, transform_indices = @transform_8, window_bounds = array<i64: 16, 1>}, {pipeline_mode = #tpu.pipeline_mode<synchronous>, transform_indices = @transform_9, window_bounds = array<i64: 32, 16>}, {pipeline_mode = #tpu.pipeline_mode<synchronous>, transform_indices = @transform_10, window_bounds = array<i64: 32, 16>}, {pipeline_mode = #tpu.pipeline_mode<synchronous>, transform_indices = @transform_11, window_bounds = array<i64: 32, 16>}, {pipeline_mode = #tpu.pipeline_mode<synchronous>, transform_indices = @transform_12, window_bounds = array<i64: 32, 1>}, {pipeline_mode = #tpu.pipeline_mode<synchronous>, transform_indices = @transform_13, window_bounds = array<i64: 32, 64>}, {pipeline_mode = #tpu.pipeline_mode<synchronous>, transform_indices = @transform_14, window_bounds = array<i64: 32, 1>}, {pipeline_mode = #tpu.pipeline_mode<synchronous>, transform_indices = @transform_15, window_bounds = array<i64: 1, 32>}, {pipeline_mode = #tpu.pipeline_mode<synchronous>, transform_indices = @transform_16, window_bounds = array<i64: 1, 1>}, {transform_indices = @transform_17, window_bounds = array<i64: 8, 1>}]} {
    %c8_i32 = arith.constant 8 : i32
    %0 = arith.muli %arg0, %c8_i32 : i32
    %1 = tpu.iota {dimensions = array<i32: 1>} : vector<1x128xi32>
    %c16_i32 = arith.constant 16 : i32
    %2 = vector.broadcast %c16_i32 : i32 to vector<1x128xi32>
    %3 = arith.cmpi slt, %1, %2 : vector<1x128xi32>
    %c0 = arith.constant 0 : index
    %c0_0 = arith.constant 0 : index
    %4 = vector.load %arg3[%c0, %c0_0] : memref<8x1xf32, #tpu.memory_space<vmem>>, vector<8x1xf32>
    %c0_1 = arith.constant 0 : index
    %c0_2 = arith.constant 0 : index
    %5 = vector.load %arg4[%c0_1, %c0_2] : memref<8x1xf32, #tpu.memory_space<vmem>>, vector<8x1xf32>
    %c0_3 = arith.constant 0 : index
    %c0_4 = arith.constant 0 : index
    %6 = vector.load %arg5[%c0_3, %c0_4] : memref<8x1xf32, #tpu.memory_space<vmem>>, vector<8x1xf32>
    %c0_5 = arith.constant 0 : index
    %c0_6 = arith.constant 0 : index
    %7 = vector.load %arg6[%c0_5, %c0_6] : memref<8x1xf32, #tpu.memory_space<vmem>>, vector<8x1xf32>
    %c0_7 = arith.constant 0 : index
    %c0_8 = arith.constant 0 : index
    %8 = vector.load %arg7[%c0_7, %c0_8] : memref<16x8xf32, #tpu.memory_space<vmem>>, vector<16x8xf32>
    %c0_9 = arith.constant 0 : index
    %c0_10 = arith.constant 0 : index
    %9 = vector.load %arg8[%c0_9, %c0_10] : memref<16x8xf32, #tpu.memory_space<vmem>>, vector<16x8xf32>
    %c0_11 = arith.constant 0 : index
    %c0_12 = arith.constant 0 : index
    %10 = vector.load %arg9[%c0_11, %c0_12] : memref<16x8xf32, #tpu.memory_space<vmem>>, vector<16x8xf32>
    %c0_13 = arith.constant 0 : index
    %c0_14 = arith.constant 0 : index
    %11 = vector.load %arg10[%c0_13, %c0_14] : memref<16x1xf32, #tpu.memory_space<vmem>>, vector<16x1xf32>
    %c0_15 = arith.constant 0 : index
    %c0_16 = arith.constant 0 : index
    %12 = vector.load %arg11[%c0_15, %c0_16] : memref<32x16xf32, #tpu.memory_space<vmem>>, vector<32x16xf32>
    %c0_17 = arith.constant 0 : index
    %c0_18 = arith.constant 0 : index
    %13 = vector.load %arg12[%c0_17, %c0_18] : memref<32x16xf32, #tpu.memory_space<vmem>>, vector<32x16xf32>
    %c0_19 = arith.constant 0 : index
    %c0_20 = arith.constant 0 : index
    %14 = vector.load %arg13[%c0_19, %c0_20] : memref<32x16xf32, #tpu.memory_space<vmem>>, vector<32x16xf32>
    %c0_21 = arith.constant 0 : index
    %c0_22 = arith.constant 0 : index
    %15 = vector.load %arg14[%c0_21, %c0_22] : memref<32x1xf32, #tpu.memory_space<vmem>>, vector<32x1xf32>
    %c0_23 = arith.constant 0 : index
    %c0_24 = arith.constant 0 : index
    %16 = vector.load %arg15[%c0_23, %c0_24] : memref<32x64xf32, #tpu.memory_space<vmem>>, vector<32x64xf32>
    %c0_25 = arith.constant 0 : index
    %c0_26 = arith.constant 0 : index
    %17 = vector.load %arg16[%c0_25, %c0_26] : memref<32x1xf32, #tpu.memory_space<vmem>>, vector<32x1xf32>
    %c0_27 = arith.constant 0 : index
    %c0_28 = arith.constant 0 : index
    %18 = vector.load %arg17[%c0_27, %c0_28] : memref<1x32xf32, #tpu.memory_space<vmem>>, vector<1x32xf32>
    %c0_29 = arith.constant 0 : index
    %c0_30 = arith.constant 0 : index
    %19 = vector.load %arg18[%c0_29, %c0_30] : memref<1x1xf32, #tpu.memory_space<vmem>>, vector<1x1xf32>
    %c0_i32 = arith.constant 0 : i32
    %c8_i32_31 = arith.constant 8 : i32
    %20 = arith.addi %c0_i32, %c8_i32_31 : i32
    %c1_i32 = arith.constant 1 : i32
    scf.for %arg20 = %c0_i32 to %20 step %c1_i32  : i32 {
      %21 = arith.index_cast %arg20 : i32 to index
      %c0_33 = arith.constant 0 : index
      %22 = vector.load %arg2[%21, %c0_33] : memref<8x128xf32, #tpu.memory_space<vmem>>, vector<1x128xf32>
      %c1_i32_34 = arith.constant 1 : i32
      %23 = tpu.dynamic_rotate %22 by %c1_i32_34 dim 1 : vector<1x128xf32>, i32 -> vector<1x128xf32>
      %c127_i32 = arith.constant 127 : i32
      %24 = tpu.dynamic_rotate %22 by %c127_i32 dim 1 : vector<1x128xf32>, i32 -> vector<1x128xf32>
      %25 = vector.broadcast %4 : vector<8x1xf32> to vector<8x128xf32>
      %26 = vector.broadcast %23 : vector<1x128xf32> to vector<8x128xf32>
      %27 = arith.mulf %25, %26 : vector<8x128xf32>
      %28 = vector.broadcast %5 : vector<8x1xf32> to vector<8x128xf32>
      %29 = vector.broadcast %22 : vector<1x128xf32> to vector<8x128xf32>
      %30 = arith.mulf %28, %29 : vector<8x128xf32>
      %31 = arith.addf %27, %30 : vector<8x128xf32>
      %32 = vector.broadcast %6 : vector<8x1xf32> to vector<8x128xf32>
      %33 = vector.broadcast %24 : vector<1x128xf32> to vector<8x128xf32>
      %34 = arith.mulf %32, %33 : vector<8x128xf32>
      %35 = arith.addf %31, %34 : vector<8x128xf32>
      %36 = vector.broadcast %7 : vector<8x1xf32> to vector<8x128xf32>
      %37 = arith.addf %35, %36 : vector<8x128xf32>
      %cst = arith.constant 0.000000e+00 : f32
      %38 = vector.broadcast %cst : f32 to vector<8x128xf32>
      %39 = arith.maximumf %37, %38 : vector<8x128xf32>
      %cst_35 = arith.constant 0.000000e+00 : f32
      %40 = vector.shape_cast %3 : vector<1x128xi1> to vector<1x128xi1>
      %41 = vector.broadcast %40 : vector<1x128xi1> to vector<8x128xi1>
      %42 = vector.broadcast %cst_35 : f32 to vector<8x128xf32>
      %43 = arith.select %41, %39, %42 : vector<8x128xi1>, vector<8x128xf32>
      %c1_i32_36 = arith.constant 1 : i32
      %44 = tpu.dynamic_rotate %43 by %c1_i32_36 dim 1 : vector<8x128xf32>, i32 -> vector<8x128xf32>
      %c127_i32_37 = arith.constant 127 : i32
      %45 = tpu.dynamic_rotate %43 by %c127_i32_37 dim 1 : vector<8x128xf32>, i32 -> vector<8x128xf32>
      %cst_38 = arith.constant dense<0.000000e+00> : vector<16x128xf32>
      %46 = tpu.matmul %8, %44, %cst_38 {dimension_numbers = #tpu.dot_dimension_numbers<[1], [0], [0], [1], [0, 0, 1, 1], [], []>} : vector<16x8xf32>, vector<8x128xf32>, vector<16x128xf32> -> vector<16x128xf32>
      %cst_39 = arith.constant dense<0.000000e+00> : vector<16x128xf32>
      %47 = tpu.matmul %9, %43, %cst_39 {dimension_numbers = #tpu.dot_dimension_numbers<[1], [0], [0], [1], [0, 0, 1, 1], [], []>} : vector<16x8xf32>, vector<8x128xf32>, vector<16x128xf32> -> vector<16x128xf32>
      %48 = arith.addf %46, %47 : vector<16x128xf32>
      %cst_40 = arith.constant dense<0.000000e+00> : vector<16x128xf32>
      %49 = tpu.matmul %10, %45, %cst_40 {dimension_numbers = #tpu.dot_dimension_numbers<[1], [0], [0], [1], [0, 0, 1, 1], [], []>} : vector<16x8xf32>, vector<8x128xf32>, vector<16x128xf32> -> vector<16x128xf32>
      %50 = arith.addf %48, %49 : vector<16x128xf32>
      %51 = vector.broadcast %11 : vector<16x1xf32> to vector<16x128xf32>
      %52 = arith.addf %50, %51 : vector<16x128xf32>
      %cst_41 = arith.constant 0.000000e+00 : f32
      %53 = vector.broadcast %cst_41 : f32 to vector<16x128xf32>
      %54 = arith.maximumf %52, %53 : vector<16x128xf32>
      %cst_42 = arith.constant 0.000000e+00 : f32
      %55 = vector.shape_cast %3 : vector<1x128xi1> to vector<1x128xi1>
      %56 = vector.broadcast %55 : vector<1x128xi1> to vector<16x128xi1>
      %57 = vector.broadcast %cst_42 : f32 to vector<16x128xf32>
      %58 = arith.select %56, %54, %57 : vector<16x128xi1>, vector<16x128xf32>
      %c1_i32_43 = arith.constant 1 : i32
      %59 = tpu.dynamic_rotate %58 by %c1_i32_43 dim 1 : vector<16x128xf32>, i32 -> vector<16x128xf32>
      %c127_i32_44 = arith.constant 127 : i32
      %60 = tpu.dynamic_rotate %58 by %c127_i32_44 dim 1 : vector<16x128xf32>, i32 -> vector<16x128xf32>
      %cst_45 = arith.constant dense<0.000000e+00> : vector<32x128xf32>
      %61 = tpu.matmul %12, %59, %cst_45 {dimension_numbers = #tpu.dot_dimension_numbers<[1], [0], [0], [1], [0, 0, 1, 1], [], []>} : vector<32x16xf32>, vector<16x128xf32>, vector<32x128xf32> -> vector<32x128xf32>
      %cst_46 = arith.constant dense<0.000000e+00> : vector<32x128xf32>
      %62 = tpu.matmul %13, %58, %cst_46 {dimension_numbers = #tpu.dot_dimension_numbers<[1], [0], [0], [1], [0, 0, 1, 1], [], []>} : vector<32x16xf32>, vector<16x128xf32>, vector<32x128xf32> -> vector<32x128xf32>
      %63 = arith.addf %61, %62 : vector<32x128xf32>
      %cst_47 = arith.constant dense<0.000000e+00> : vector<32x128xf32>
      %64 = tpu.matmul %14, %60, %cst_47 {dimension_numbers = #tpu.dot_dimension_numbers<[1], [0], [0], [1], [0, 0, 1, 1], [], []>} : vector<32x16xf32>, vector<16x128xf32>, vector<32x128xf32> -> vector<32x128xf32>
      %65 = arith.addf %63, %64 : vector<32x128xf32>
      %66 = vector.broadcast %15 : vector<32x1xf32> to vector<32x128xf32>
      %67 = arith.addf %65, %66 : vector<32x128xf32>
      %68 = arith.addi %0, %arg20 : i32
      %69 = arith.index_cast %68 : i32 to index
      %70 = memref.load %arg1[%69] : memref<8xi32, #tpu.memory_space<smem>>
      %71 = vector.broadcast %70 : i32 to vector<1x128xi32>
      %72 = arith.cmpi slt, %1, %71 : vector<1x128xi32>
      %cst_48 = arith.constant 0.000000e+00 : f32
      %73 = vector.broadcast %cst_48 : f32 to vector<32x128xf32>
      %74 = arith.maximumf %67, %73 : vector<32x128xf32>
      %cst_49 = arith.constant 0.000000e+00 : f32
      %75 = vector.shape_cast %72 : vector<1x128xi1> to vector<1x128xi1>
      %76 = vector.broadcast %75 : vector<1x128xi1> to vector<32x128xi1>
      %77 = vector.broadcast %cst_49 : f32 to vector<32x128xf32>
      %78 = arith.select %76, %74, %77 : vector<32x128xi1>, vector<32x128xf32>
      %cst_50 = arith.constant dense<0.000000e+00> : vector<32xf32>
      %79 = vector.multi_reduction <add>, %78, %cst_50 [1] : vector<32x128xf32> to vector<32xf32>
      %80 = vector.shape_cast %79 : vector<32xf32> to vector<32x1xf32>
      %81 = arith.mulf %78, %78 : vector<32x128xf32>
      %cst_51 = arith.constant dense<0.000000e+00> : vector<32xf32>
      %82 = vector.multi_reduction <add>, %81, %cst_51 [1] : vector<32x128xf32> to vector<32xf32>
      %83 = vector.shape_cast %82 : vector<32xf32> to vector<32x1xf32>
      %cst_52 = arith.constant 6.250000e-02 : f32
      %84 = vector.broadcast %cst_52 : f32 to vector<32x1xf32>
      %85 = arith.mulf %80, %84 : vector<32x1xf32>
      %86 = arith.mulf %85, %80 : vector<32x1xf32>
      %87 = arith.subf %83, %86 : vector<32x1xf32>
      %cst_53 = arith.constant 0.000000e+00 : f32
      %88 = vector.broadcast %cst_53 : f32 to vector<32x1xf32>
      %89 = arith.maximumf %87, %88 : vector<32x1xf32>
      %cst_54 = arith.constant 0.0666666701 : f32
      %90 = vector.broadcast %cst_54 : f32 to vector<32x1xf32>
      %91 = arith.mulf %89, %90 : vector<32x1xf32>
      %92 = math.sqrt %91 : vector<32x1xf32>
      %93 = tpu.concatenate %85, %92 in 0 : vector<32x1xf32>, vector<32x1xf32> -> vector<64x1xf32>
      %cst_55 = arith.constant dense<0.000000e+00> : vector<32x1xf32>
      %94 = tpu.matmul %16, %93, %cst_55 {dimension_numbers = #tpu.dot_dimension_numbers<[1], [0], [0], [1], [0, 0, 1, 1], [], []>} : vector<32x64xf32>, vector<64x1xf32>, vector<32x1xf32> -> vector<32x1xf32>
      %95 = arith.addf %94, %17 : vector<32x1xf32>
      %cst_56 = arith.constant 0.000000e+00 : f32
      %96 = vector.broadcast %cst_56 : f32 to vector<32x1xf32>
      %97 = arith.maximumf %95, %96 : vector<32x1xf32>
      %cst_57 = arith.constant dense<0.000000e+00> : vector<1x1xf32>
      %98 = tpu.matmul %18, %97, %cst_57 {dimension_numbers = #tpu.dot_dimension_numbers<[1], [0], [0], [1], [0, 0, 1, 1], [], []>} : vector<1x32xf32>, vector<32x1xf32>, vector<1x1xf32> -> vector<1x1xf32>
      %99 = arith.addf %98, %19 : vector<1x1xf32>
      %100 = arith.index_cast %arg20 : i32 to index
      %c0_58 = arith.constant 0 : index
      %101 = vector.load %arg19[%100, %c0_58] : memref<8x1xf32, #tpu.memory_space<vmem>>, vector<1x1xf32>
      tpu.vector_store %arg19[%100, %c0_58], %99 {strides = array<i32>} : memref<8x1xf32, #tpu.memory_space<vmem>>, vector<1x1xf32>,
    }
    %c8_i32_32 = arith.constant 8 : i32
    return
  }
  func.func @transform_0(%arg0: i32, %arg1: memref<8xi32, #tpu.memory_space<smem>>) -> (i32, i32) {
    %c0_i32 = arith.constant 0 : i32
    %c0_i32_0 = arith.constant 0 : i32
    return %arg0, %c0_i32 : i32, i32
  }
  func.func @transform_1(%arg0: i32, %arg1: memref<8xi32, #tpu.memory_space<smem>>) -> (i32, i32) {
    %c0_i32 = arith.constant 0 : i32
    %c0_i32_0 = arith.constant 0 : i32
    %c0_i32_1 = arith.constant 0 : i32
    return %c0_i32, %c0_i32_0 : i32, i32
  }
  func.func @transform_2(%arg0: i32, %arg1: memref<8xi32, #tpu.memory_space<smem>>) -> (i32, i32) {
    %c0_i32 = arith.constant 0 : i32
    %c0_i32_0 = arith.constant 0 : i32
    %c0_i32_1 = arith.constant 0 : i32
    return %c0_i32, %c0_i32_0 : i32, i32
  }
  func.func @transform_3(%arg0: i32, %arg1: memref<8xi32, #tpu.memory_space<smem>>) -> (i32, i32) {
    %c0_i32 = arith.constant 0 : i32
    %c0_i32_0 = arith.constant 0 : i32
    %c0_i32_1 = arith.constant 0 : i32
    return %c0_i32, %c0_i32_0 : i32, i32
  }
  func.func @transform_4(%arg0: i32, %arg1: memref<8xi32, #tpu.memory_space<smem>>) -> (i32, i32) {
    %c0_i32 = arith.constant 0 : i32
    %c0_i32_0 = arith.constant 0 : i32
    %c0_i32_1 = arith.constant 0 : i32
    return %c0_i32, %c0_i32_0 : i32, i32
  }
  func.func @transform_5(%arg0: i32, %arg1: memref<8xi32, #tpu.memory_space<smem>>) -> (i32, i32) {
    %c0_i32 = arith.constant 0 : i32
    %c0_i32_0 = arith.constant 0 : i32
    %c0_i32_1 = arith.constant 0 : i32
    return %c0_i32, %c0_i32_0 : i32, i32
  }
  func.func @transform_6(%arg0: i32, %arg1: memref<8xi32, #tpu.memory_space<smem>>) -> (i32, i32) {
    %c0_i32 = arith.constant 0 : i32
    %c0_i32_0 = arith.constant 0 : i32
    %c0_i32_1 = arith.constant 0 : i32
    return %c0_i32, %c0_i32_0 : i32, i32
  }
  func.func @transform_7(%arg0: i32, %arg1: memref<8xi32, #tpu.memory_space<smem>>) -> (i32, i32) {
    %c0_i32 = arith.constant 0 : i32
    %c0_i32_0 = arith.constant 0 : i32
    %c0_i32_1 = arith.constant 0 : i32
    return %c0_i32, %c0_i32_0 : i32, i32
  }
  func.func @transform_8(%arg0: i32, %arg1: memref<8xi32, #tpu.memory_space<smem>>) -> (i32, i32) {
    %c0_i32 = arith.constant 0 : i32
    %c0_i32_0 = arith.constant 0 : i32
    %c0_i32_1 = arith.constant 0 : i32
    return %c0_i32, %c0_i32_0 : i32, i32
  }
  func.func @transform_9(%arg0: i32, %arg1: memref<8xi32, #tpu.memory_space<smem>>) -> (i32, i32) {
    %c0_i32 = arith.constant 0 : i32
    %c0_i32_0 = arith.constant 0 : i32
    %c0_i32_1 = arith.constant 0 : i32
    return %c0_i32, %c0_i32_0 : i32, i32
  }
  func.func @transform_10(%arg0: i32, %arg1: memref<8xi32, #tpu.memory_space<smem>>) -> (i32, i32) {
    %c0_i32 = arith.constant 0 : i32
    %c0_i32_0 = arith.constant 0 : i32
    %c0_i32_1 = arith.constant 0 : i32
    return %c0_i32, %c0_i32_0 : i32, i32
  }
  func.func @transform_11(%arg0: i32, %arg1: memref<8xi32, #tpu.memory_space<smem>>) -> (i32, i32) {
    %c0_i32 = arith.constant 0 : i32
    %c0_i32_0 = arith.constant 0 : i32
    %c0_i32_1 = arith.constant 0 : i32
    return %c0_i32, %c0_i32_0 : i32, i32
  }
  func.func @transform_12(%arg0: i32, %arg1: memref<8xi32, #tpu.memory_space<smem>>) -> (i32, i32) {
    %c0_i32 = arith.constant 0 : i32
    %c0_i32_0 = arith.constant 0 : i32
    %c0_i32_1 = arith.constant 0 : i32
    return %c0_i32, %c0_i32_0 : i32, i32
  }
  func.func @transform_13(%arg0: i32, %arg1: memref<8xi32, #tpu.memory_space<smem>>) -> (i32, i32) {
    %c0_i32 = arith.constant 0 : i32
    %c0_i32_0 = arith.constant 0 : i32
    %c0_i32_1 = arith.constant 0 : i32
    return %c0_i32, %c0_i32_0 : i32, i32
  }
  func.func @transform_14(%arg0: i32, %arg1: memref<8xi32, #tpu.memory_space<smem>>) -> (i32, i32) {
    %c0_i32 = arith.constant 0 : i32
    %c0_i32_0 = arith.constant 0 : i32
    %c0_i32_1 = arith.constant 0 : i32
    return %c0_i32, %c0_i32_0 : i32, i32
  }
  func.func @transform_15(%arg0: i32, %arg1: memref<8xi32, #tpu.memory_space<smem>>) -> (i32, i32) {
    %c0_i32 = arith.constant 0 : i32
    %c0_i32_0 = arith.constant 0 : i32
    %c0_i32_1 = arith.constant 0 : i32
    return %c0_i32, %c0_i32_0 : i32, i32
  }
  func.func @transform_16(%arg0: i32, %arg1: memref<8xi32, #tpu.memory_space<smem>>) -> (i32, i32) {
    %c0_i32 = arith.constant 0 : i32
    %c0_i32_0 = arith.constant 0 : i32
    %c0_i32_1 = arith.constant 0 : i32
    return %c0_i32, %c0_i32_0 : i32, i32
  }
  func.func @transform_17(%arg0: i32, %arg1: memref<8xi32, #tpu.memory_space<smem>>) -> (i32, i32) {
    %c0_i32 = arith.constant 0 : i32
    %c0_i32_0 = arith.constant 0 : i32
    return %arg0, %c0_i32 : i32, i32
  }
}

</mosaic_0001>

<bundles_post_ra>
// kernel: tpu_custom_call.1
= control target key start
LH: loop header
LB: loop body
LE: loop exit
PB: predicated region body
PF: predicated region fallthrough
CT: control target
= control target key end

     0   :  { %s1689_s0 = inlined_call_operand.vmem [shape: s32[8], index: 0, kind: input, shape index: {}]   ;;  %s1690_s1 = inlined_call_operand.vmem [shape: f32[8,128], index: 1, kind: input, shape index: {}]   ;;  %s1691_s2 = inlined_call_operand.vmem [shape: f32[8,1], index: 2, kind: input, shape index: {}]   ;;  %s1692_s3 = inlined_call_operand.vmem [shape: f32[8,1], index: 3, kind: input, shape index: {}]   ;;  %s1693_s4 = inlined_call_operand.vmem [shape: f32[8,1], index: 4, kind: input, shape index: {}]   ;;  %s1694_s5 = inlined_call_operand.vmem [shape: f32[8,1], index: 5, kind: input, shape index: {}]   ;;  %s1695_s6 = inlined_call_operand.vmem [shape: f32[16,8], index: 6, kind: input, shape index: {}]   ;;  %s1696_s7 = inlined_call_operand.vmem [shape: f32[16,8], index: 7, kind: input, shape index: {}]   ;;  %s1697_s8 = inlined_call_operand.vmem [shape: f32[16,8], index: 8, kind: input, shape index: {}]   ;;  %s1698_s9 = inlined_call_operand.vmem [shape: f32[16,1], index: 9, kind: input, shape index: {}]   ;;  %s1699_s10 = inlined_call_operand.vmem [shape: f32[32,16], index: 10, kind: input, shape index: {}]   ;;  %s1700_s11 = inlined_call_operand.vmem [shape: f32[32,16], index: 11, kind: input, shape index: {}]   ;;  %s1701_s12 = inlined_call_operand.vmem [shape: f32[32,16], index: 12, kind: input, shape index: {}]   ;;  %s1702_s13 = inlined_call_operand.vmem [shape: f32[32,1], index: 13, kind: input, shape index: {}]   ;;  %s1703_s14 = inlined_call_operand.vmem [shape: f32[32,64], index: 14, kind: input, shape index: {}]   ;;  %s1704_s15 = inlined_call_operand.vmem [shape: f32[32,1], index: 15, kind: input, shape index: {}]   ;;  %s1705_s16 = inlined_call_operand.vmem [shape: f32[1,32], index: 16, kind: input, shape index: {}]   ;;  %s1706_s18 = inlined_call_operand.vmem [shape: f32[8,1], index: 18, kind: output, shape index: {}]   ;;  %s1707_s17 = inlined_call_operand.<no memory space> [shape: f32[1,1], index: 17, kind: input, shape index: {}]  }
   0x1   :  { %1709 = sst [smem:[#allocation6_spill]] %s1689_s0  ;;  %v27_v0 = vstv %s1707_s17 }
   0x2   :  { %1710 = sst [smem:[#allocation7_spill]] %s1690_s1  ;;  %s1713_s29 = sld [smem:[#allocation6_spill]]  ;;  %28 = vst [vmem:[#allocation4] sm:$0x1] %v27_v0 }
   0x3   :  { %1711 = sst [smem:[#allocation8_spill]] %s1691_s2 }
   0x4   :  { %1712 = sst [smem:[#allocation9_spill]] %s1701_s12 }
   0x8   :  { %s23_s12 = sshll.u32 %s1713_s29, 4  ;;  %s24_s12 = int_to_ptr.vmem [resolvable:$true] %s23_s12 }
   0x9   :  { %s1258_s19 = scalar_lea.vmem %s24_s12, 16  ;;  %p1263_p1 = scmp.lt.s32.totalorder %s24_s12, %s24_s12 }
   0xa   :  { %p1259_p0 = scmp.ne.s32.totalorder %s24_s12, %s1258_s19  ;;  %p1264_p2 = scmp.lt.s32.totalorder %s1258_s19, %s1258_s19 }
   0xc   :  { %p1265_p3 = por %p1264_p2, %p1263_p1 }
   0xe   :  { %p1266_p4 = pnand %p1265_p3, %p1259_p0 }
  0x10   :  { %1269 = shalt.err (!%p1266_p4)  }
  0x11   :  { %s1280_s1 = smov [#allocation3]  }
  0x12   :  { %26 = dma.vmem_to_smem %s24_s12, 16, %s1280_s1, [#allocation2] }
  0x13   :  { %1274 = dma.done.wait [#allocation2], 16 }
  0x14   :  { %1275 = vsyncadd [#allocation2], 4294967280 }
  0x15   :  { %30 = sfence }
  0x16   :  { %v66_v1 = vlaneseq  ;;  %s1714_s22 = sld [smem:[#allocation8_spill]]  ;;  %v1396_v3 = vld [vmem:[%s1692_s3] sm:$0xff]  ;;  %v1416_v7 = vld [vmem:[%s1695_s6 + $0x8] sm:$0xff]  ;;  %v1465_v17 = vld [vmem:[%s1699_s10 + $0x10] sm:$0xff]  ;;  %s1715_s19 = sld [smem:[#allocation9_spill]] }
  0x17   :  { %v1401_v4 = vld [vmem:[%s1693_s4] sm:$0xff]  ;;  %v1429_v10 = vld [vmem:[%s1696_s7 + $0x8] sm:$0xff]  ;;  %v1470_v18 = vld [vmem:[%s1699_s10 + $0x18] sm:$0xff] }
  0x18   :  { %v1406_v5 = vld [vmem:[%s1694_s5] sm:$0xff]  ;;  %v1419_v8 = vand.u32 127, %v66_v1  ;;  %v1439_v12 = vld [vmem:[%s1697_s8 + $0x8] sm:$0xff]  ;;  %v1485_v21 = vld [vmem:[%s1700_s11 + $0x10] sm:$0xff] }
  0x19   :  { %v1411_v6 = vld [vmem:[%s1695_s6] sm:$0xff]  ;;  %v1449_v14 = vld [vmem:[%s1698_s9 + $0x8] sm:$0xff]  ;;  %v1490_v22 = vld [vmem:[%s1700_s11 + $0x18] sm:$0xff] }
  0x1a   :  { %v1424_v9 = vld [vmem:[%s1696_s7] sm:$0xff]  ;;  %vm68_vm0 = vcmp.lt.s32.totalorder %v1419_v8, 16  ;;  %v1460_v16 = vld [vmem:[%s1699_s10 + $0x8] sm:$0xff]  ;;  %v1525_v29 = vld [vmem:[%s1702_s13 + $0x10] sm:$0xff] }
  0x1b   :  { %v1434_v11 = vld [vmem:[%s1697_s8] sm:$0xff]  ;;  %v1480_v20 = vld [vmem:[%s1700_s11 + $0x8] sm:$0xff]  ;;  %v1530_v30 = vld [vmem:[%s1702_s13 + $0x18] sm:$0xff] }
  0x1c   :  { %v1391_v2 = vld [vmem:[%s1714_s22] sm:$0xff]  ;;  %v1500_v24 = vld [vmem:[%s1715_s19 + $0x8] sm:$0xff]  ;;  %v1505_v25 = vld [vmem:[%s1715_s19 + $0x10] sm:$0xff]  ;;  %s1579_s22 = smov 0  }
  0x1d   :  { %v1444_v13 = vld [vmem:[%s1698_s9] sm:$0xff]  ;;  %v1510_v26 = vld [vmem:[%s1715_s19 + $0x18] sm:$0xff]  ;;  %v1520_v28 = vld [vmem:[%s1702_s13 + $0x8] sm:$0xff] }
  0x1e   :  { %v1455_v15 = vld [vmem:[%s1699_s10] sm:$0xff]  ;;  %v1540_v32 = vld [vmem:[%s1703_s14 + $0x8] sm:$0xff]  ;;  %v1545_v33 = vld [vmem:[%s1703_s14 + $0x10] sm:$0xff] }
  0x1f   :  { %v1475_v19 = vld [vmem:[%s1700_s11] sm:$0xff]  ;;  %v1550_v34 = vld [vmem:[%s1703_s14 + $0x18] sm:$0xff]  ;;  %v1560_v36 = vld [vmem:[%s1704_s15 + $0x8] sm:$0xff] }
  0x20   :  { %v1495_v23 = vld [vmem:[%s1715_s19] sm:$0xff]  ;;  %v1565_v37 = vld [vmem:[%s1704_s15 + $0x10] sm:$0xff]  ;;  %v1570_v38 = vld [vmem:[%s1704_s15 + $0x18] sm:$0xff] }
  0x21   :  { %v1515_v27 = vld [vmem:[%s1702_s13] sm:$0xff] }
  0x22   :  { %v1535_v31 = vld [vmem:[%s1703_s14] sm:$0xff] }
  0x23   :  { %v1555_v35 = vld [vmem:[%s1704_s15] sm:$0xff] }
  0x24   :  { %v1575_v39 = vld [vmem:[%s1705_s16] sm:$0x1] }
  0x25   :  { %v1577_v40 = vld [vmem:[#allocation4] sm:$0x1] }
  0x26 LB: > { %v1281_v41 = vmov 0   ;;  %s1716_s17 = sld [smem:[#allocation7_spill]]  ;;  %s1282_s7 = smov 1   ;;  %vm165_vm1 = vcmask 64512   ;;  %v125_v43 = vshrl.u32 %v66_v1, 7  ;;  %vm435_vm2 = vcmask 130048   ;;  %vm1176_vm3 = vmpackc.low %vm68_vm0, %vm68_vm0  ;;  %s1278_s22 = sphi %s1579_s22, %s112_s22  }
  0x27   : > { %1239 = vset.pattern.permute.xlu1 %v1281_v41  ;;  %1238 = vset.pattern.permute.xlu0 %v1281_v41  ;;  %s1283_s2 = smov 127   ;;  %s756_s23 = sld [smem:[#allocation3 + %s1278_s22]]  ;;  %vm837_vm5 = vcmask 523264   ;;  %vm1285_vm14 = vmmov 0   ;;  %vm939_vm15 = vcmask 261120  }
  0x28   : > { %142 = vperm.xlu1 %1239, %v1401_v4   ;;  %121 = vperm.xlu0 %1238, %v1391_v2   ;;  %v126_v46 = vsub.s32 0, %v125_v43  ;;  %s1013_s12 = scalar_lea.vmem %s1706_s18, %s1278_s22 }
  0x29   : > { %1099 = vmatprep.mubr.msk.f32.mxu0 %vm165_vm1, %v1424_v9  ;;  %1116 = vmatprep.mubr.msk.f32.mxu1 %vm435_vm2, %v1475_v19 }
  0x2c   : > { %s113_s11 = scalar_lea.vmem %s1716_s17, %s1278_s22  ;;  %131 = vperm.xlu0 %1238, %v1396_v3   ;;  %s112_s22 = sadd.s32 1, %s1278_s22  }
  0x2d   : > { %v114_v42 = vld [vmem:[%s113_s11] sm:$0x1]  ;;  %p109_p5 = scmp.ge.s32.totalorder %s112_s22, 8  }
  0x2e   : > { %115 = vrot.lane.b32.xlu1 %v114_v42, %s1282_s7  ;;  %v137_v48 = vrot.slane %v114_v42, %v126_v46 }
  0x30   : > { %153 = vperm.xlu0 %1238, %v1406_v5  }
  0x32   : > { %117 = vrot.lane.b32.xlu1 %v114_v42, %s1283_s2 }
  0xa7   : > { %v143_v44 = vpop.permute.xlu1 %142  ;;  %v122_v45 = vpop.permute.xlu0 %121 }
  0xab   : > { %v116_v47 = vpop.permute.xlu1 %115  ;;  %v132_v50 = vpop.permute.xlu0 %131 }
  0xac   : > { %v127_v49 = vrot.slane %v116_v47, %v126_v46  ;;  %v138_v53 = vmul.f32 %v137_v48, %v132_v50 }
  0xae   : > { %v128_v51 = vmul.f32 %v127_v49, %v122_v45 }
  0xaf   : > { %v118_v52 = vpop.permute.xlu1 %117  ;;  %v154_v58 = vpop.permute.xlu0 %153 }
  0xb0   : > { %v148_v54 = vrot.slane %v118_v52, %v126_v46  ;;  %v139_v55 = vadd.f32 %v138_v53, %v128_v51 }
  0xb2   : > { %v149_v56 = vmul.f32 %v148_v54, %v143_v44 }
  0xb4   : > { %v150_v57 = vadd.f32 %v149_v56, %v139_v55 }
  0xb6   : > { %v156_v59 = vadd.f32 %v154_v58, %v150_v57 }
  0xb8   : > { %v157_v60 = vmax.f32 %v156_v59, 0.0 }
  0xba   : > { %1097 = vmatprep.subr.msk.mxu0 %vm68_vm0, %v157_v60  ;;  %v160_v61 = vsel %vm68_vm0, %v157_v60, 0.0 }
  0xbb   : > { %1098 = vmatpush3.msk.msra.mxu0 %vm68_vm0, %v157_v60  ;;  %163 = vrot.lane.b32.xlu1 %v160_v61, %s1283_s2 }
  0xbc   : > { %161 = vrot.lane.b32.xlu0 %v160_v61, %s1282_s7  ;;  %1100 = vmatmul.mubr.msk.f32.vlgmr.msra.gmra.mrb[0].mxu0 %vm165_vm1, %v1429_v10 }
  0xbd   : > { %1104 = vmatprep.mubr.msk.f32.mxu0 %vm165_vm1, %v1411_v6 }
  0xbf   : > { %418 = vperm.xlu1 %1239, %v1449_v14  }
  0xc0   : > { %413 = vperm.xlu0 %1238, %v1444_v13  }
 0x12d   : > { %v164_v63 = vpop.permute.xlu1 %163 }
 0x12e   : > { %v162_v62 = vpop.permute.xlu0 %161 }
 0x12f   : > { %1102 = vmatprep.subr.mxu0 %v162_v62 }
 0x130   : > { %1103 = vmatpush3.msra.mxu0 %v162_v62  ;;  %v757_v62 = vstv %s756_s23 }
 0x131   : > { %1105 = vmatmul.mubr.msk.f32.vlgmr.msra.gmra.mrb[0].mxu0 %vm165_vm1, %v1416_v7  ;;  %1107 = vmatprep.subr.mxu0 %v164_v63  ;;  %vm1656_vm4 = vcmp.lt.s32.totalorder %v1419_v8, %v757_v62 }
 0x132   : > { %1108 = vmatpush3.msra.mxu0 %v164_v63  ;;  %1109 = vmatprep.mubr.msk.f32.mxu0 %vm165_vm1, %v1434_v11 }
 0x139   : > { %1110 = vmatmul.mubr.msk.f32.vlgmr.msra.gmra.mrb[0].mxu0 %vm165_vm1, %v1439_v12  ;;  %vm1014_vm1 = vcmask 0  }
 0x13a   : > { %1158 = vmatprep.mubr.msk.f32.mxu0 %vm837_vm5, %v1535_v31 }
 0x13e   : > { %v419_v0 = vpop.permute.xlu1 %418 }
 0x13f   : > { %v414_v42 = vpop.permute.xlu0 %413 }
 0x20c   : > { %v1111_v41 = vpop.f32.mrb[0].mxu0 }
 0x20d   : > { %v422_v43 = vadd.f32 %v1111_v41, %v419_v0  ;;  %v400_v44 = vpop.f32.mrb[1].mxu0 }
 0x20e   : > { %v421_v45 = vadd.f32 %v414_v42, %v400_v44 }
 0x20f   : > { %v424_v46 = vmax.f32 %v422_v43, 0.0 }
 0x210   : > { %v423_v47 = vmax.f32 %v421_v45, 0.0 }
 0x211   : > { %v426_v48 = vsel %vm68_vm0, %v424_v46, 0.0 }
 0x212   : > { %v425_v49 = vsel %vm68_vm0, %v423_v47, 0.0  ;;  %v1175_v50 = vpack.c.bf16 %v424_v46, %v423_v47 }
 0x213   : > { %v1245_v51 = vpack.i.bf16 %v426_v48, %v425_v49 }
 0x214   : > { %1177 = vmatprep.subr.msk.bf16.mxu1 %vm1176_vm3, %v1175_v50 }
 0x215   : > { %1180 = vmatpush3.bf16.msk.msra.mxu1 %vm1176_vm3, %v1175_v50  ;;  %1246 = vrot.lane.b32.xlu1 %v1245_v51, %s1283_s2 }
 0x216   : > { %1241 = vrot.lane.b32.xlu0 %v1245_v51, %s1282_s7 }
 0x218   : > { %1117 = vmatmul.mubr.msk.f32.vlgmr.msra.gmra.mrb[0].mxu1 %vm435_vm2, %v1480_v20 }
 0x219   : > { %738 = vperm.xlu1 %1239, %v1520_v28   ;;  %1119 = vmatprep.mubr.msk.f32.mxu1 %vm435_vm2, %v1485_v21 }
 0x21a   : > { %733 = vperm.xlu0 %1238, %v1515_v27  }
 0x21c   : > { %1120 = vmatmul.mubr.msk.f32.gmra.mrb[2].mxu1 %vm435_vm2, %v1490_v22 }
 0x21d   : > { %748 = vperm.xlu1 %1239, %v1530_v30   ;;  %1126 = vmatprep.mubr.msk.f32.mxu1 %vm435_vm2, %v1455_v15 }
 0x21e   : > { %743 = vperm.xlu0 %1238, %v1525_v29  }
 0x287   : > { %v1247_v52 = vpop.permute.xlu1 %1246 }
 0x288   : > { %v1242_v53 = vpop.permute.xlu0 %1241  ;;  %v1249_v54 = vunpack.i.h.bf16 %v1247_v52  ;;  %v1248_v55 = vunpack.i.l.bf16 %v1247_v52 }
 0x289   : > { %v1244_v56 = vunpack.i.h.bf16 %v1242_v53  ;;  %v1243_v57 = vunpack.i.l.bf16 %v1242_v53 }
 0x28a   : > { %v1185_v59 = vpack.c.bf16 %v1249_v54, %v1248_v55 }
 0x28b   : > { %v1181_v58 = vpack.c.bf16 %v1244_v56, %v1243_v57 }
 0x28d   : > { %1182 = vmatprep.subr.bf16.mxu1 %v1181_v58 }
 0x28e   : > { %1184 = vmatpush3.bf16.msra.mxu1 %v1181_v58 }
 0x28f   : > { %1186 = vmatprep.subr.bf16.mxu1 %v1185_v59 }
 0x291   : > { %1127 = vmatmul.mubr.msk.f32.vlgmr.msra.gmra.mrb[0].mxu1 %vm435_vm2, %v1460_v16 }
 0x292   : > { %1188 = vmatpush3.bf16.msra.mxu1 %v1185_v59  ;;  %1129 = vmatprep.mubr.msk.f32.mxu1 %vm435_vm2, %v1465_v17 }
 0x295   : > { %1130 = vmatmul.mubr.msk.f32.gmra.mrb[2].mxu1 %vm435_vm2, %v1470_v18 }
 0x296   : > { %1136 = vmatprep.mubr.msk.f32.mxu1 %vm435_vm2, %v1495_v23 }
 0x298   : > { %v739_v60 = vpop.permute.xlu1 %738 }
 0x299   : > { %1137 = vmatmul.mubr.msk.f32.vlgmr.msra.gmra.mrb[0].mxu1 %vm435_vm2, %v1500_v24  ;;  %v734_v61 = vpop.permute.xlu0 %733 }
 0x29a   : > { %1139 = vmatprep.mubr.msk.f32.mxu1 %vm435_vm2, %v1505_v25 }
 0x29c   : > { %v749_v45 = vpop.permute.xlu1 %748 }
 0x29d   : > { %1140 = vmatmul.mubr.msk.f32.gmra.mrb[2].mxu1 %vm435_vm2, %v1510_v26  ;;  %v744_v48 = vpop.permute.xlu0 %743 }
 0x36c   : > { %v1138_v63 = vpop.f32.mrb[0].mxu1 }
 0x36d   : > { %v752_v0 = vadd.f32 %v1138_v63, %v739_v60  ;;  %v708_v41 = vpop.f32.mrb[1].mxu1 }
 0x36e   : > { %v751_v42 = vadd.f32 %v734_v61, %v708_v41 }
 0x36f   : > { %v760_v44 = vmax.f32 %v752_v0, 0.0 }
 0x370   : > { %v759_v46 = vmax.f32 %v751_v42, 0.0  ;;  %v1141_v47 = vpop.f32.mrb[2].mxu1 }
 0x371   : > { %v718_v49 = vpop.f32.mrb[3].mxu1  ;;  %v766_v50 = vsel %vm1656_vm4, %v760_v44, 0.0  ;;  %v754_v51 = vadd.f32 %v1141_v47, %v749_v45 }
 0x372   : > { %v753_v52 = vadd.f32 %v744_v48, %v718_v49  ;;  %771 = vadd.xlane.f32.xlu1 %v766_v50  ;;  %v765_v53 = vsel %vm1656_vm4, %v759_v46, 0.0  ;;  %v778_v56 = vmul.f32 %v766_v50, %v766_v50 }
 0x373   : > { %769 = vadd.xlane.f32.xlu0 %v765_v53  ;;  %v777_v54 = vmul.f32 %v765_v53, %v765_v53  ;;  %v762_v57 = vmax.f32 %v754_v51, 0.0 }
 0x374   : > { %v761_v55 = vmax.f32 %v753_v52, 0.0 }
 0x375   : > { %v768_v60 = vsel %vm1656_vm4, %v762_v57, 0.0 }
 0x376   : > { %781 = vadd.xlane.f32.xlu1 %v777_v54  ;;  %v767_v58 = vsel %vm1656_vm4, %v761_v55, 0.0  ;;  %v780_v61 = vmul.f32 %v768_v60, %v768_v60 }
 0x377   : > { %783 = vadd.xlane.f32.xlu0 %v778_v56  ;;  %v779_v59 = vmul.f32 %v767_v58, %v767_v58 }
 0x37a   : > { %785 = vadd.xlane.f32.xlu1 %v779_v59 }
 0x37b   : > { %775 = vadd.xlane.f32.xlu0 %v768_v60 }
 0x37f   : > { %773 = vadd.xlane.f32.xlu0 %v767_v58 }
 0x383   : > { %787 = vadd.xlane.f32.xlu0 %v780_v61 }
 0x3ff   : > { %v772_v62 = vpop.xlane.xlu1 %771 }
 0x400   : > { %v790_v63 = vmul.f32 0.0625, %v772_v62  ;;  %v770_v0 = vpop.xlane.xlu0 %769 }
 0x401   : > { %v789_v41 = vmul.f32 0.0625, %v770_v0 }
 0x402   : > { %v794_v42 = vmul.f32 %v790_v63, %v772_v62 }
 0x403   : > { %v793_v44 = vmul.f32 %v789_v41, %v770_v0  ;;  %v1189_v45 = vpack.c.bf16 %v790_v63, %v789_v41  ;;  %v782_v46 = vpop.xlane.xlu1 %781 }
 0x404   : > { %v784_v47 = vpop.xlane.xlu0 %783 }
 0x405   : > { %v797_v48 = vsub.f32 %v782_v46, %v793_v44  ;;  %v798_v43 = vsub.f32 %v784_v47, %v794_v42  ;;  %1190 = vmatprep.subr.bf16.mxu0 %v1189_v45 }
 0x406   : > { %1192 = vmatpush3.bf16.msra.mxu0 %v1189_v45 }
 0x407   : > { %v801_v49 = vmax.f32 %v797_v48, 0.0  ;;  %v802_v50 = vmax.f32 %v798_v43, 0.0  ;;  %v786_v60 = vpop.xlane.xlu1 %785 }
 0x408   : > { %v776_v51 = vpop.xlane.xlu0 %775 }
 0x409   : > { %v805_v52 = vmul.f32 0.06666667, %v801_v49  ;;  %v806_v53 = vmul.f32 0.06666667, %v802_v50  ;;  %v792_v54 = vmul.f32 0.0625, %v776_v51 }
 0x40b   : > { %1250 = vrsqrt.f32 %v805_v52  ;;  %v796_v57 = vmul.f32 %v792_v54, %v776_v51  ;;  %vm811_vm6 = vcmp.eq.f32.partialorder %v805_v52, inf  ;;  %vm813_vm7 = vcmp.eq.f32.partialorder %v805_v52, 0.0 }
 0x40c   : > { %1252 = vrsqrt.f32 %v806_v53  ;;  %v774_v55 = vpop.xlane.xlu0 %773  ;;  %v814_v48 = vand.u32 2147483648, %v805_v52  ;;  %vm818_vm8 = vcmp.eq.f32.partialorder %v806_v53, inf  ;;  %v821_v50 = vand.u32 2147483648, %v806_v53 }
 0x40d   : > { %v791_v56 = vmul.f32 0.0625, %v774_v55  ;;  %vm820_vm9 = vcmp.eq.f32.partialorder %v806_v53, 0.0 }
 0x40f   : > { %v795_v58 = vmul.f32 %v791_v56, %v774_v55  ;;  %v1193_v59 = vpack.c.bf16 %v792_v54, %v791_v56 }
 0x410   : > { %v788_v61 = vpop.xlane.xlu0 %787 }
 0x411   : > { %v799_v62 = vsub.f32 %v786_v60, %v795_v58  ;;  %v800_v63 = vsub.f32 %v788_v61, %v796_v57  ;;  %1194 = vmatprep.subr.bf16.mxu0 %v1193_v59 }
 0x412   : > { %1196 = vmatpush3.bf16.msra.mxu0 %v1193_v59 }
 0x413   : > { %v803_v0 = vmax.f32 %v799_v62, 0.0  ;;  %v804_v41 = vmax.f32 %v800_v63, 0.0 }
 0x415   : > { %v1251_v42 = vpop.eup %1250  ;;  %v807_v44 = vmul.f32 0.06666667, %v803_v0  ;;  %v808_v45 = vmul.f32 0.06666667, %v804_v41 }
 0x416   : > { %v1253_v46 = vpop.eup %1252  ;;  %v810_v47 = vmul.f32 %v1251_v42, %v805_v52 }
 0x417   : > { %1254 = vrsqrt.f32 %v808_v45  ;;  %v817_v43 = vmul.f32 %v1253_v46, %v806_v53  ;;  %vm832_vm10 = vcmp.eq.f32.partialorder %v808_v45, inf  ;;  %v835_v61 = vand.u32 2147483648, %v808_v45 }
 0x418   : > { %v812_v49 = vsel %vm811_vm6, %v805_v52, %v810_v47  ;;  %1256 = vrsqrt.f32 %v807_v44  ;;  %vm825_vm11 = vcmp.eq.f32.partialorder %v807_v44, inf  ;;  %v828_v62 = vand.u32 2147483648, %v807_v44 }
 0x419   : > { %v815_v51 = vsel %vm813_vm7, %v814_v48, %v812_v49  ;;  %v819_v54 = vsel %vm818_vm8, %v806_v53, %v817_v43  ;;  %vm834_vm12 = vcmp.eq.f32.partialorder %v808_v45, 0.0  ;;  %vm827_vm13 = vcmp.eq.f32.partialorder %v807_v44, 0.0 }
 0x41a   : > { %v822_v55 = vsel %vm820_vm9, %v821_v50, %v819_v54  ;;  %v1284_v53 = vmov 0.0|0.0  }
 0x41b   : > { %v1197_v56 = vpack.c.bf16 %v822_v55, %v815_v51  ;;  %1205 = vmatprep.subr.bf16.mxu1 %v1284_v53 }
 0x41d   : > { %1198 = vmatprep.subr.bf16.mxu0 %v1197_v56 }
 0x41e   : > { %1200 = vmatpush3.bf16.msra.mxu0 %v1197_v56 }
 0x421   : > { %v1255_v57 = vpop.eup %1254 }
 0x422   : > { %v1257_v58 = vpop.eup %1256  ;;  %v831_v59 = vmul.f32 %v1255_v57, %v808_v45 }
 0x423   : > { %v824_v60 = vmul.f32 %v1257_v58, %v807_v44 }
 0x424   : > { %v833_v63 = vsel %vm832_vm10, %v808_v45, %v831_v59  ;;  %v1286_v45 = vmov 0.0  }
 0x425   : > { %v826_v52 = vsel %vm825_vm11, %v807_v44, %v824_v60  ;;  %v836_v0 = vsel %vm834_vm12, %v835_v61, %v833_v63  ;;  %1172 = vmatprep.mubr.msk.f32.mxu1 %vm1285_vm14, %v1286_v45 }
 0x426   : > { %v829_v41 = vsel %vm827_vm13, %v828_v62, %v826_v52 }
 0x427   : > { %v1201_v42 = vpack.c.bf16 %v836_v0, %v829_v41 }
 0x429   : > { %1202 = vmatprep.subr.bf16.mxu0 %v1201_v42 }
 0x42a   : > { %1204 = vmatpush3.bf16.msra.mxu0 %v1201_v42 }
 0x42d   : > { %1159 = vmatmul.mubr.msk.f32.vlgmr.msra.gmra.mrb[2].mxu0 %vm837_vm5, %v1540_v32 }
 0x42e   : > { %1161 = vmatprep.mubr.msk.f32.mxu0 %vm837_vm5, %v1545_v33 }
 0x431   : > { %1162 = vmatmul.mubr.msk.f32.gmra.mrb[4].mxu0 %vm837_vm5, %v1550_v34 }
 0x500   : > { %v1160_v44 = vpop.f32.mrb[2].mxu0 }
 0x501   : > { %v922_v46 = vadd.f32 %v1160_v44, %v1560_v36  ;;  %v916_v47 = vpop.f32.mrb[3].mxu0 }
 0x502   : > { %v917_v48 = vadd.f32 %v916_v47, %v1555_v35 }
 0x503   : > { %v936_v43 = vmax.f32 %v922_v46, 0.0 }
 0x504   : > { %v935_v49 = vmax.f32 %v917_v48, 0.0  ;;  %v1163_v50 = vpop.f32.mrb[4].mxu0 }
 0x505   : > { %v932_v51 = vadd.f32 %v1163_v50, %v1570_v38  ;;  %v926_v54 = vpop.f32.mrb[5].mxu0 }
 0x506   : > { %v1206_v55 = vpack.c.bf16 %v936_v43, %v935_v49  ;;  %v927_v56 = vadd.f32 %v926_v54, %v1565_v37 }
 0x507   : > { %v938_v57 = vmax.f32 %v932_v51, 0.0 }
 0x508   : > { %v937_v58 = vmax.f32 %v927_v56, 0.0  ;;  %1207 = vmatpush3.bf16.msra.mxu1 %v1206_v55 }
 0x509   : > { %1208 = vmatprep.subr.bf16.mxu1 %v1284_v53 }
 0x50a   : > { %v1209_v59 = vpack.c.bf16 %v938_v57, %v937_v58 }
 0x50c   : > { %1210 = vmatpush3.bf16.msra.mxu1 %v1209_v59 }
 0x50f   : > { %1173 = vmatmul.mubr.msk.f32.vlgmr.msra.gmra.mrb[4].mxu1 %vm939_vm15, %v1575_v39 }
 0x5df   :  { %111 = sbr.rel (!%p109_p5) target bundleno = 38 (0x26), region = 97 }
 0x5e2   : > { %v1009_v60 = vpop.f32.mrb[4].mxu1 }
 0x5e3   : > { %v1010_v61 = vadd.f32 %v1009_v60, %v1577_v40  ;;  %v1174_v62 = vpop.f32.mrb[5].mxu1 }
 0x5e5   : > { %1015 = vst.msk [vmem:[%s1013_s12] sm:$0x1] %vm1014_vm1, %v1010_v61 }

</bundles_post_ra>
